<compile_context>
chip_gen: v6e
topology: v6e:2x2x1
jax: 0.10.0
libtpu: 0.0.40
codegen_flags: <defaults>
</compile_context>

<pallas_src>
import jax
import jax.numpy as jnp
from jax.experimental import pallas as pl
from jax.experimental.pallas import tpu as pltpu  # noqa: F401  (TPU backend)


def rnn_chatbot_kernel(x_ref, h0_ref, w_ih_ref, w_hh_ref, b_ref,
                       w_fc_ref, b_fc_ref, out_ref, h_out_ref):
    """Single-invocation kernel: batched input projection + unrolled RNN + fc.

    x_ref    : (Bp*T, I)  batch-first inputs, flattened (row = b*T + t)
    h0_ref   : (Bp, Hp)   initial hidden state (zero-padded)
    w_ih_ref : (I, Hp)    = W_ih^T (zero-padded)
    w_hh_ref : (Hp, Hp)   = W_hh^T (zero-padded)
    b_ref    : (1, Hp)    = b_ih + b_hh (zero-padded)
    w_fc_ref : (Hp, Op)   = W_fc^T (zero-padded)
    b_fc_ref : (1, Op)
    out_ref  : (Bp, Op)   fc(h_T)
    h_out_ref: (Bp, Hp)   final hidden state
    """
    Bp, Hp = h0_ref.shape
    T = x_ref.shape[0] // Bp

    # (1) Hoisted projection: one big MXU pass, bias broadcast exactly once.
    xw = (jnp.dot(x_ref[...], w_ih_ref[...], preferred_element_type=jnp.float32)
          + b_ref[...])                       # (Bp*T, Hp)
    xw = xw.reshape(Bp, T, Hp)                # split leading (sublane) dim only

    w_hh = w_hh_ref[...]
    h = h0_ref[...]

    # (2) Fully unrolled recurrence (T is static & small): only the h @ W_hh
    #     matmul per step is serially dependent.
    for t in range(T):
        h = jnp.tanh(xw[:, t, :]
                     + jnp.dot(h, w_hh, preferred_element_type=jnp.float32))

    # (3) Fused final Linear; write out first, hidden store overlaps epilogue.
    out_ref[...] = (jnp.dot(h, w_fc_ref[...], preferred_element_type=jnp.float32)
                    + b_fc_ref[...])
    h_out_ref[...] = h


def _round_up(n, m):
    return ((n + m - 1) // m) * m


def simple_rnn_chatbot_forward(x, hidden, params):
    """x: (B, T, I) float32 (batch_first, like PyTorch); hidden: (1, B, H).
    Returns (output (B, O), hidden (1, B, H))."""
    B, T, I = x.shape
    H = params["w_hh"].shape[0]
    O = params["w_fc"].shape[0]

    # Hardware-friendly padding: batch -> sublane multiple (8),
    # hidden/output widths -> lane multiples (128) for unmasked stores.
    Bp = max(_round_up(B, 8), 8)
    Hp = max(_round_up(H, 128), 128)
    Op = max(_round_up(O, 128), 128)

    f32 = jnp.float32
    # Pre-transpose weights (PyTorch stores (out, in)), fold the two RNN
    # biases, zero-pad to the tile-aligned sizes. Zero padding keeps the
    # padded hidden lanes identically zero through tanh (tanh(0) = 0).
    w_ih_t = jnp.zeros((I, Hp), f32).at[:, :H].set(params["w_ih"].T.astype(f32))
    w_hh_t = jnp.zeros((Hp, Hp), f32).at[:H, :H].set(params["w_hh"].T.astype(f32))
    b_rnn = jnp.zeros((1, Hp), f32).at[0, :H].set(
        (params["b_ih"] + params["b_hh"]).astype(f32))
    w_fc_t = jnp.zeros((Hp, Op), f32).at[:H, :O].set(params["w_fc"].T.astype(f32))
    b_fc = jnp.zeros((1, Op), f32).at[0, :O].set(params["b_fc"].astype(f32))

    x_p = jnp.zeros((Bp, T, I), f32).at[:B].set(x.astype(f32))
    x_2d = x_p.reshape(Bp * T, I)             # free reshape, NO transpose
    h0_p = jnp.zeros((Bp, Hp), f32).at[:B, :H].set(hidden[0].astype(f32))

    full = lambda shape: pl.BlockSpec(shape, lambda: (0,) * len(shape))

    out_p, h_p = pl.pallas_call(
        rnn_chatbot_kernel,
        out_shape=(jax.ShapeDtypeStruct((Bp, Op), f32),
                   jax.ShapeDtypeStruct((Bp, Hp), f32)),
        in_specs=[full((Bp * T, I)), full((Bp, Hp)),
                  full((I, Hp)), full((Hp, Hp)), full((1, Hp)),
                  full((Hp, Op)), full((1, Op))],
        out_specs=(full((Bp, Op)), full((Bp, Hp))),
    )(x_2d, h0_p, w_ih_t, w_hh_t, b_rnn, w_fc_t, b_fc)

    out = out_p[:B, :O]
    h_final = h_p[:B, :H]
    return out, h_final[None, :, :]           # hidden back to (1, B, H)


def init_params(key, input_size, hidden_size, output_size):
    """Deterministic init mirroring PyTorch's U(-1/sqrt(H), 1/sqrt(H))."""
    ks = jax.random.split(key, 6)
    bound = 1.0 / jnp.sqrt(jnp.float32(hidden_size))
    u = lambda k, shape: jax.random.uniform(k, shape, jnp.float32, -bound, bound)
    return {
        "w_ih": u(ks[0], (hidden_size, input_size)),
        "w_hh": u(ks[1], (hidden_size, hidden_size)),
        "b_ih": u(ks[2], (hidden_size,)),
        "b_hh": u(ks[3], (hidden_size,)),
        "w_fc": u(ks[4], (output_size, hidden_size)),
        "b_fc": u(ks[5], (output_size,)),
    }


def reference_forward(x, hidden, params):
    """Pure-JAX reference matching torch semantics (for sanity check)."""
    h = hidden[0]
    T = x.shape[1]
    for t in range(T):
        h = jnp.tanh(x[:, t, :] @ params["w_ih"].T + params["b_ih"]
                     + h @ params["w_hh"].T + params["b_hh"])
    out = h @ params["w_fc"].T + params["b_fc"]
    return out, h[None, :, :]


if __name__ == "__main__":
    B, T, I, H, O = 2, 8, 16, 32, 16

    key = jax.random.PRNGKey(0)
    k_x, k_h, k_p = jax.random.split(key, 3)

    x = jax.random.normal(k_x, (B, T, I), dtype=jnp.float32)
    hidden0 = jax.random.normal(k_h, (1, B, H), dtype=jnp.float32)
    params = init_params(k_p, I, H, O)

    out, hidden = simple_rnn_chatbot_forward(x, hidden0, params)
    out = jax.block_until_ready(out)
    hidden = jax.block_until_ready(hidden)

    ref_out, ref_hidden = reference_forward(x, hidden0, params)
    assert out.shape == (B, O) and hidden.shape == (1, B, H)
    assert jnp.allclose(out, ref_out, atol=1e-5, rtol=1e-5)
    assert jnp.allclose(hidden, ref_hidden, atol=1e-5, rtol=1e-5)

    print("KERNEL_OK")
</pallas_src>

<mosaic_0001>
module attributes {stable_mosaic.version = 11 : i64} {
  func.func @rnn_chatbot_kernel(%arg0: memref<64x16xf32, #tpu.memory_space<vmem>>, %arg1: memref<8x128xf32, #tpu.memory_space<vmem>>, %arg2: memref<16x128xf32, #tpu.memory_space<vmem>>, %arg3: memref<128x128xf32, #tpu.memory_space<vmem>>, %arg4: memref<1x128xf32, #tpu.memory_space<vmem>>, %arg5: memref<128x128xf32, #tpu.memory_space<vmem>>, %arg6: memref<1x128xf32, #tpu.memory_space<vmem>>, %arg7: memref<8x128xf32, #tpu.memory_space<vmem>>, %arg8: memref<8x128xf32, #tpu.memory_space<vmem>>) attributes {dimension_semantics = [], scalar_prefetch = 0 : i64, scratch_operands = 0 : i64, tpu.core_type = #tpu.core_type<tc>} {
    %c0 = arith.constant 0 : index
    %c0_0 = arith.constant 0 : index
    %0 = vector.load %arg0[%c0, %c0_0] : memref<64x16xf32, #tpu.memory_space<vmem>>, vector<64x16xf32>
    %c0_1 = arith.constant 0 : index
    %c0_2 = arith.constant 0 : index
    %1 = vector.load %arg2[%c0_1, %c0_2] : memref<16x128xf32, #tpu.memory_space<vmem>>, vector<16x128xf32>
    %cst = arith.constant dense<0.000000e+00> : vector<64x128xf32>
    %2 = tpu.matmul %0, %1, %cst {dimension_numbers = #tpu.dot_dimension_numbers<[1], [0], [0], [1], [0, 0, 1, 1], [], []>} : vector<64x16xf32>, vector<16x128xf32>, vector<64x128xf32> -> vector<64x128xf32>
    %c0_3 = arith.constant 0 : index
    %c0_4 = arith.constant 0 : index
    %3 = vector.load %arg4[%c0_3, %c0_4] : memref<1x128xf32, #tpu.memory_space<vmem>>, vector<1x128xf32>
    %4 = vector.broadcast %3 : vector<1x128xf32> to vector<64x128xf32>
    %5 = arith.addf %2, %4 : vector<64x128xf32>
    %6 = vector.shape_cast %5 : vector<64x128xf32> to vector<8x8x128xf32>
    %c0_5 = arith.constant 0 : index
    %c0_6 = arith.constant 0 : index
    %7 = vector.load %arg3[%c0_5, %c0_6] : memref<128x128xf32, #tpu.memory_space<vmem>>, vector<128x128xf32>
    %c0_7 = arith.constant 0 : index
    %c0_8 = arith.constant 0 : index
    %8 = vector.load %arg1[%c0_7, %c0_8] : memref<8x128xf32, #tpu.memory_space<vmem>>, vector<8x128xf32>
    %9 = vector.extract_strided_slice %6 {offsets = [0, 0, 0], sizes = [8, 1, 128], strides = [1, 1, 1]} : vector<8x8x128xf32> to vector<8x1x128xf32>
    %10 = vector.shape_cast %9 : vector<8x1x128xf32> to vector<8x128xf32>
    %cst_9 = arith.constant dense<0.000000e+00> : vector<8x128xf32>
    %11 = tpu.matmul %8, %7, %cst_9 {dimension_numbers = #tpu.dot_dimension_numbers<[1], [0], [0], [1], [0, 0, 1, 1], [], []>} : vector<8x128xf32>, vector<128x128xf32>, vector<8x128xf32> -> vector<8x128xf32>
    %12 = arith.addf %10, %11 : vector<8x128xf32>
    %13 = math.tanh %12 : vector<8x128xf32>
    %14 = vector.extract_strided_slice %6 {offsets = [0, 1, 0], sizes = [8, 1, 128], strides = [1, 1, 1]} : vector<8x8x128xf32> to vector<8x1x128xf32>
    %15 = vector.shape_cast %14 : vector<8x1x128xf32> to vector<8x128xf32>
    %cst_10 = arith.constant dense<0.000000e+00> : vector<8x128xf32>
    %16 = tpu.matmul %13, %7, %cst_10 {dimension_numbers = #tpu.dot_dimension_numbers<[1], [0], [0], [1], [0, 0, 1, 1], [], []>} : vector<8x128xf32>, vector<128x128xf32>, vector<8x128xf32> -> vector<8x128xf32>
    %17 = arith.addf %15, %16 : vector<8x128xf32>
    %18 = math.tanh %17 : vector<8x128xf32>
    %19 = vector.extract_strided_slice %6 {offsets = [0, 2, 0], sizes = [8, 1, 128], strides = [1, 1, 1]} : vector<8x8x128xf32> to vector<8x1x128xf32>
    %20 = vector.shape_cast %19 : vector<8x1x128xf32> to vector<8x128xf32>
    %cst_11 = arith.constant dense<0.000000e+00> : vector<8x128xf32>
    %21 = tpu.matmul %18, %7, %cst_11 {dimension_numbers = #tpu.dot_dimension_numbers<[1], [0], [0], [1], [0, 0, 1, 1], [], []>} : vector<8x128xf32>, vector<128x128xf32>, vector<8x128xf32> -> vector<8x128xf32>
    %22 = arith.addf %20, %21 : vector<8x128xf32>
    %23 = math.tanh %22 : vector<8x128xf32>
    %24 = vector.extract_strided_slice %6 {offsets = [0, 3, 0], sizes = [8, 1, 128], strides = [1, 1, 1]} : vector<8x8x128xf32> to vector<8x1x128xf32>
    %25 = vector.shape_cast %24 : vector<8x1x128xf32> to vector<8x128xf32>
    %cst_12 = arith.constant dense<0.000000e+00> : vector<8x128xf32>
    %26 = tpu.matmul %23, %7, %cst_12 {dimension_numbers = #tpu.dot_dimension_numbers<[1], [0], [0], [1], [0, 0, 1, 1], [], []>} : vector<8x128xf32>, vector<128x128xf32>, vector<8x128xf32> -> vector<8x128xf32>
    %27 = arith.addf %25, %26 : vector<8x128xf32>
    %28 = math.tanh %27 : vector<8x128xf32>
    %29 = vector.extract_strided_slice %6 {offsets = [0, 4, 0], sizes = [8, 1, 128], strides = [1, 1, 1]} : vector<8x8x128xf32> to vector<8x1x128xf32>
    %30 = vector.shape_cast %29 : vector<8x1x128xf32> to vector<8x128xf32>
    %cst_13 = arith.constant dense<0.000000e+00> : vector<8x128xf32>
    %31 = tpu.matmul %28, %7, %cst_13 {dimension_numbers = #tpu.dot_dimension_numbers<[1], [0], [0], [1], [0, 0, 1, 1], [], []>} : vector<8x128xf32>, vector<128x128xf32>, vector<8x128xf32> -> vector<8x128xf32>
    %32 = arith.addf %30, %31 : vector<8x128xf32>
    %33 = math.tanh %32 : vector<8x128xf32>
    %34 = vector.extract_strided_slice %6 {offsets = [0, 5, 0], sizes = [8, 1, 128], strides = [1, 1, 1]} : vector<8x8x128xf32> to vector<8x1x128xf32>
    %35 = vector.shape_cast %34 : vector<8x1x128xf32> to vector<8x128xf32>
    %cst_14 = arith.constant dense<0.000000e+00> : vector<8x128xf32>
    %36 = tpu.matmul %33, %7, %cst_14 {dimension_numbers = #tpu.dot_dimension_numbers<[1], [0], [0], [1], [0, 0, 1, 1], [], []>} : vector<8x128xf32>, vector<128x128xf32>, vector<8x128xf32> -> vector<8x128xf32>
    %37 = arith.addf %35, %36 : vector<8x128xf32>
    %38 = math.tanh %37 : vector<8x128xf32>
    %39 = vector.extract_strided_slice %6 {offsets = [0, 6, 0], sizes = [8, 1, 128], strides = [1, 1, 1]} : vector<8x8x128xf32> to vector<8x1x128xf32>
    %40 = vector.shape_cast %39 : vector<8x1x128xf32> to vector<8x128xf32>
    %cst_15 = arith.constant dense<0.000000e+00> : vector<8x128xf32>
    %41 = tpu.matmul %38, %7, %cst_15 {dimension_numbers = #tpu.dot_dimension_numbers<[1], [0], [0], [1], [0, 0, 1, 1], [], []>} : vector<8x128xf32>, vector<128x128xf32>, vector<8x128xf32> -> vector<8x128xf32>
    %42 = arith.addf %40, %41 : vector<8x128xf32>
    %43 = math.tanh %42 : vector<8x128xf32>
    %44 = vector.extract_strided_slice %6 {offsets = [0, 7, 0], sizes = [8, 1, 128], strides = [1, 1, 1]} : vector<8x8x128xf32> to vector<8x1x128xf32>
    %45 = vector.shape_cast %44 : vector<8x1x128xf32> to vector<8x128xf32>
    %cst_16 = arith.constant dense<0.000000e+00> : vector<8x128xf32>
    %46 = tpu.matmul %43, %7, %cst_16 {dimension_numbers = #tpu.dot_dimension_numbers<[1], [0], [0], [1], [0, 0, 1, 1], [], []>} : vector<8x128xf32>, vector<128x128xf32>, vector<8x128xf32> -> vector<8x128xf32>
    %47 = arith.addf %45, %46 : vector<8x128xf32>
    %48 = math.tanh %47 : vector<8x128xf32>
    %c0_17 = arith.constant 0 : index
    %c0_18 = arith.constant 0 : index
    %49 = vector.load %arg5[%c0_17, %c0_18] : memref<128x128xf32, #tpu.memory_space<vmem>>, vector<128x128xf32>
    %cst_19 = arith.constant dense<0.000000e+00> : vector<8x128xf32>
    %50 = tpu.matmul %48, %49, %cst_19 {dimension_numbers = #tpu.dot_dimension_numbers<[1], [0], [0], [1], [0, 0, 1, 1], [], []>} : vector<8x128xf32>, vector<128x128xf32>, vector<8x128xf32> -> vector<8x128xf32>
    %c0_20 = arith.constant 0 : index
    %c0_21 = arith.constant 0 : index
    %51 = vector.load %arg6[%c0_20, %c0_21] : memref<1x128xf32, #tpu.memory_space<vmem>>, vector<1x128xf32>
    %52 = vector.broadcast %51 : vector<1x128xf32> to vector<8x128xf32>
    %53 = arith.addf %50, %52 : vector<8x128xf32>
    %c0_22 = arith.constant 0 : index
    %c0_23 = arith.constant 0 : index
    %54 = vector.load %arg7[%c0_22, %c0_23] : memref<8x128xf32, #tpu.memory_space<vmem>>, vector<8x128xf32>
    tpu.vector_store %arg7[%c0_22, %c0_23], %53 {strides = array<i32>} : memref<8x128xf32, #tpu.memory_space<vmem>>, vector<8x128xf32>,
    %c0_24 = arith.constant 0 : index
    %c0_25 = arith.constant 0 : index
    %55 = vector.load %arg8[%c0_24, %c0_25] : memref<8x128xf32, #tpu.memory_space<vmem>>, vector<8x128xf32>
    tpu.vector_store %arg8[%c0_24, %c0_25], %48 {strides = array<i32>} : memref<8x128xf32, #tpu.memory_space<vmem>>, vector<8x128xf32>,
    return
  }
}

</mosaic_0001>

<bundles_post_ra>
// kernel: tpu_custom_call.1
= control target key start
LH: loop header
LB: loop body
LE: loop exit
PB: predicated region body
PF: predicated region fallthrough
CT: control target
= control target key end

     0   :  { %14 = vsyncpa [#allocation3], 0  ;;  %s2674_s0 = inlined_call_operand.vmem [shape: f32[64,16], index: 0, kind: input, shape index: {}]   ;;  %s2675_s1 = inlined_call_operand.vmem [shape: f32[8,128], index: 1, kind: input, shape index: {}]   ;;  %s2676_s2 = inlined_call_operand.vmem [shape: f32[16,128], index: 2, kind: input, shape index: {}]   ;;  %s2677_s3 = inlined_call_operand.hbm [shape: f32[128,128], index: 3, kind: input, shape index: {}]   ;;  %s2678_s4 = inlined_call_operand.vmem [shape: f32[1,128], index: 4, kind: input, shape index: {}]   ;;  %s2679_s5 = inlined_call_operand.hbm [shape: f32[128,128], index: 5, kind: input, shape index: {}]   ;;  %s2680_s6 = inlined_call_operand.vmem [shape: f32[1,128], index: 6, kind: input, shape index: {}]   ;;  %s2681_s7 = inlined_call_operand.hbm [shape: f32[8,128], index: 7, kind: output, shape index: {0}]   ;;  %s2682_s8 = inlined_call_operand.hbm [shape: f32[8,128], index: 8, kind: output, shape index: {1}]  }
   0x1   :  { %15 = vsyncpa [#allocation6], 0 }
   0x2   :  { %16 = vsyncpa [#allocation4], 0 }
   0x3   :  { %17 = vsyncpa [#allocation9], 0  ;;  %s2106_s27 = smov [#allocation2]  }
   0x4   :  { %s29_s28 = sshll.u32 %s2106_s27, 4  ;;  %s30_s28 = int_to_ptr.vmem [resolvable:$true] %s29_s28 }
   0x5   :  { %s2026_s29 = scalar_lea.vmem %s30_s28, 2048  ;;  %p2031_p1 = scmp.lt.s32.totalorder %s30_s28, %s30_s28 }
   0x6   :  { %p2027_p0 = scmp.ne.s32.totalorder %s30_s28, %s2026_s29  ;;  %p2032_p2 = scmp.lt.s32.totalorder %s2026_s29, %s2026_s29 }
   0x8   :  { %p2033_p3 = por %p2032_p2, %p2031_p1 }
   0xa   :  { %p2034_p4 = pnand %p2033_p3, %p2027_p0 }
   0xc   :  { %2037 = shalt.err (!%p2034_p4)
}
   0xd   :  { %s2107_s30 = smov 128   ;;  %s2108_s9 = smov 8  }
   0xe   :  { %35 = dma.hbm_to_vmem [thread:$0]  %s2677_s3, 2048, %s30_s28, [#allocation3], %s2107_s30, %s2107_s30, %s2108_s9  }
   0xf   :  { %s2109_s12 = smov [#allocation5]  }
  0x10   :  { %s43_s13 = sshll.u32 %s2109_s12, 4  ;;  %s44_s13 = int_to_ptr.vmem [resolvable:$true] %s43_s13 }
  0x11   :  { %s2046_s14 = scalar_lea.vmem %s44_s13, 2048  ;;  %p2051_p6 = scmp.lt.s32.totalorder %s44_s13, %s44_s13 }
  0x12   :  { %p2047_p5 = scmp.ne.s32.totalorder %s44_s13, %s2046_s14  ;;  %p2052_p7 = scmp.lt.s32.totalorder %s2046_s14, %s2046_s14 }
  0x14   :  { %p2053_p8 = por %p2052_p7, %p2051_p6 }
  0x16   :  { %p2054_p9 = pnand %p2053_p8, %p2047_p5 }
  0x18   :  { %2057 = shalt.err (!%p2054_p9)
}
  0x19   :  { %49 = dma.hbm_to_vmem [thread:$0]  %s2679_s5, 2048, %s44_s13, [#allocation6], %s2107_s30, %s2107_s30, %s2108_s9  }
  0x1a   :  { %2098 = dma.done.wait [#allocation3], 2048  }
  0x1b   :  { %2099 = vsyncadd [#allocation3], 4294965248 }
  0x1c   :  { %2100 = dma.done.wait [#allocation6], 2048  }
  0x1d   :  { %2101 = vsyncadd [#allocation6], 4294965248  ;;  %v2110_v0 = vmov 0.0   ;;  %vm2111_vm0 = vmmov 0   ;;  %v2168_v1 = vld [vmem:[#allocation2 + $0x78] sm:$0xff]  ;;  %v2170_v2 = vld [vmem:[#allocation2 + $0x70] sm:$0xff] }
  0x1e   :  { %1559 = vmatprep.subr.mxu1 %v2110_v0  ;;  %1591 = vmatprep.mubr.msk.f32.mxu1 %vm2111_vm0, %v2110_v0  ;;  %v2174_v3 = vld [vmem:[#allocation2 + $0x68] sm:$0xff]  ;;  %v66_v5 = vld [vmem:[%s2676_s2] sm:$0xff]  ;;  %vm75_vm1 = vcmask 130048   ;;  %v2194_v9 = vld [vmem:[#allocation2 + $0x58] sm:$0xff]  ;;  %vm333_vm2 = vcmask 1041409   ;;  %vm336_vm3 = vcmask 1042434  }
  0x1f   :  { %1560 = vmatpush3.msra.mxu1 %v2168_v1  ;;  %v67_v4 = vld [vmem:[%s2676_s2 + $0x8] sm:$0xff]  ;;  %v2184_v6 = vld [vmem:[#allocation2 + $0x60] sm:$0xff]  ;;  %v60_v10 = vld [vmem:[%s2674_s0 + $0x10] sm:$0xff]  ;;  %vm339_vm4 = vcmask 1043459   ;;  %vm342_vm5 = vcmask 1044484   ;;  %vm345_vm6 = vcmask 1045509  }
  0x20   :  { %1561 = vmatprep.subr.mxu1 %v2110_v0  ;;  %1543 = vmatprep.subr.mxu0 %v67_v4  ;;  %v58_v7 = vld [vmem:[%s2674_s0] sm:$0xff]  ;;  %v59_v8 = vld [vmem:[%s2674_s0 + $0x8] sm:$0xff]  ;;  %v2202_v11 = vld [vmem:[#allocation2 + $0x50] sm:$0xff]  ;;  %vm348_vm7 = vcmask 1046534   ;;  %vm351_vm8 = vcmask 1047559  }
  0x21   :  { %1562 = vmatpush3.msra.mxu1 %v2170_v2  ;;  %1544 = vmatpush3.msra.mxu0 %v67_v4  ;;  %v61_v12 = vld [vmem:[%s2674_s0 + $0x18] sm:$0xff]  ;;  %v2211_v13 = vld [vmem:[#allocation2 + $0x48] sm:$0xff]  ;;  %v62_v14 = vld [vmem:[%s2674_s0 + $0x20] sm:$0xff] }
  0x22   :  { %1563 = vmatprep.subr.mxu1 %v2110_v0  ;;  %1545 = vmatprep.subr.mxu0 %v66_v5  ;;  %v2220_v15 = vld [vmem:[#allocation2 + $0x40] sm:$0xff]  ;;  %v63_v16 = vld [vmem:[%s2674_s0 + $0x28] sm:$0xff]  ;;  %v2229_v17 = vld [vmem:[#allocation2 + $0x38] sm:$0xff] }
  0x23   :  { %1564 = vmatpush3.msra.mxu1 %v2174_v3  ;;  %1546 = vmatpush3.msra.mxu0 %v66_v5  ;;  %v64_v18 = vld [vmem:[%s2674_s0 + $0x30] sm:$0xff]  ;;  %v65_v20 = vld [vmem:[%s2674_s0 + $0x38] sm:$0xff]  ;;  %v2247_v21 = vld [vmem:[#allocation2 + $0x28] sm:$0xff] }
  0x24   :  { %1565 = vmatprep.subr.mxu1 %v2110_v0  ;;  %1547 = vmatprep.mubr.msk.f32.mxu0 %vm75_vm1, %v58_v7  ;;  %v2238_v19 = vld [vmem:[#allocation2 + $0x30] sm:$0xff]  ;;  %v2253_v22 = vld [vmem:[#allocation2 + $0x20] sm:$0xff]  ;;  %v2259_v23 = vld [vmem:[#allocation2 + $0x18] sm:$0xff] }
  0x25   :  { %1566 = vmatpush3.msra.mxu1 %v2184_v6  ;;  %1548 = vmatmul.mubr.msk.f32.vlgmr.msra.gmra.mxu0 %vm75_vm1, %v59_v8  ;;  %v2265_v24 = vld [vmem:[#allocation2 + $0x10] sm:$0xff]  ;;  %v2271_v25 = vld [vmem:[#allocation2 + $0x8] sm:$0xff]  ;;  %v2277_v26 = vld [vmem:[#allocation2] sm:$0xff] }
  0x26   :  { %1567 = vmatprep.subr.mxu1 %v2110_v0  ;;  %1550 = vmatprep.mubr.msk.f32.mxu0 %vm75_vm1, %v60_v10  ;;  %v221_v27 = vld [vmem:[%s2675_s1] sm:$0xff] }
  0x27   :  { %1568 = vmatpush3.msra.mxu1 %v2194_v9  ;;  %1594 = vmatprep.subr.mxu0 %v2110_v0  ;;  %v1370_v35 = vld [vmem:[%s2678_s4] ss:$0 sm:$0xff]  ;;  %s2112_s4 = smov [#allocation8]  }
  0x28   :  { %1569 = vmatprep.subr.mxu1 %v2110_v0  ;;  %1595 = vmatpush3.msra.mxu0 %v2168_v1  ;;  %s1356_s14 = sshll.u32 %s2112_s4, 4  ;;  %s1357_s14 = int_to_ptr.vmem [resolvable:$true] %s1356_s14 }
  0x29   :  { %1570 = vmatpush3.msra.mxu1 %v2202_v11  ;;  %1551 = vmatmul.mubr.msk.f32.gmra.mxu0 %vm75_vm1, %v61_v12  ;;  %s2058_s15 = scalar_lea.vmem %s1357_s14, 128  ;;  %p2063_p11 = scmp.lt.s32.totalorder %s1357_s14, %s1357_s14 }
  0x2a   :  { %1571 = vmatprep.subr.mxu1 %v2110_v0  ;;  %1553 = vmatprep.mubr.msk.f32.mxu0 %vm75_vm1, %v62_v14  ;;  %p2059_p10 = scmp.ne.s32.totalorder %s1357_s14, %s2058_s15  ;;  %p2064_p12 = scmp.lt.s32.totalorder %s2058_s15, %s2058_s15 }
  0x2b   :  { %1572 = vmatpush3.msra.mxu1 %v2211_v13  ;;  %1596 = vmatprep.subr.mxu0 %v2110_v0 }
  0x2c   :  { %1573 = vmatprep.subr.mxu1 %v2110_v0  ;;  %1597 = vmatpush3.msra.mxu0 %v2170_v2  ;;  %p2065_p13 = por %p2064_p12, %p2063_p11 }
  0x2d   :  { %1574 = vmatpush3.msra.mxu1 %v2220_v15  ;;  %1554 = vmatmul.mubr.msk.f32.gmra.mxu0 %vm75_vm1, %v63_v16 }
  0x2e   :  { %1575 = vmatprep.subr.mxu1 %v2110_v0  ;;  %1556 = vmatprep.mubr.msk.f32.mxu0 %vm75_vm1, %v64_v18  ;;  %p2066_p0 = pnand %p2065_p13, %p2059_p10 }
  0x2f   :  { %1576 = vmatpush3.msra.mxu1 %v2229_v17  ;;  %1598 = vmatprep.subr.mxu0 %v2110_v0 }
  0x30   :  { %1577 = vmatprep.subr.mxu1 %v2110_v0  ;;  %1599 = vmatpush3.msra.mxu0 %v2174_v3 }
  0x31   :  { %1578 = vmatpush3.msra.mxu1 %v2238_v19  ;;  %1557 = vmatmul.mubr.msk.f32.gmra.mxu0 %vm75_vm1, %v65_v20 }
  0x32   :  { %1579 = vmatprep.subr.mxu1 %v2110_v0  ;;  %1600 = vmatprep.subr.mxu0 %v2110_v0 }
  0x33   :  { %1580 = vmatpush3.msra.mxu1 %v2247_v21  ;;  %1601 = vmatpush3.msra.mxu0 %v2184_v6 }
  0x34   :  { %1581 = vmatprep.subr.mxu1 %v2110_v0  ;;  %1602 = vmatprep.subr.mxu0 %v2110_v0 }
  0x35   :  { %1582 = vmatpush3.msra.mxu1 %v2253_v22  ;;  %1603 = vmatpush3.msra.mxu0 %v2194_v9 }
  0x36   :  { %1583 = vmatprep.subr.mxu1 %v2110_v0  ;;  %1604 = vmatprep.subr.mxu0 %v2110_v0 }
  0x37   :  { %1584 = vmatpush3.msra.mxu1 %v2259_v23  ;;  %1605 = vmatpush3.msra.mxu0 %v2202_v11 }
  0x38   :  { %1585 = vmatprep.subr.mxu1 %v2110_v0  ;;  %1606 = vmatprep.subr.mxu0 %v2110_v0 }
  0x39   :  { %1586 = vmatpush3.msra.mxu1 %v2265_v24  ;;  %1607 = vmatpush3.msra.mxu0 %v2211_v13 }
  0x3a   :  { %1587 = vmatprep.subr.mxu1 %v2110_v0  ;;  %1608 = vmatprep.subr.mxu0 %v2110_v0 }
  0x3b   :  { %1588 = vmatpush3.msra.mxu1 %v2271_v25  ;;  %1609 = vmatpush3.msra.mxu0 %v2220_v15 }
  0x3c   :  { %1589 = vmatprep.subr.mxu1 %v2110_v0  ;;  %1610 = vmatprep.subr.mxu0 %v2110_v0 }
  0x3d   :  { %1590 = vmatpush3.msra.mxu1 %v2277_v26  ;;  %1611 = vmatpush3.msra.mxu0 %v2229_v17 }
  0x3e   :  { %1592 = vmatmul.mubr.f32.vlgmr.msra.gmra.mxu1 %v221_v27  ;;  %1612 = vmatprep.subr.mxu0 %v2110_v0 }
  0x3f   :  { %1626 = vmatprep.mubr.msk.f32.mxu0 %vm2111_vm0, %v2110_v0  ;;  %1613 = vmatpush3.msra.mxu0 %v2238_v19 }
  0x40   :  { %1629 = vmatprep.subr.mxu1 %v2110_v0  ;;  %1614 = vmatprep.subr.mxu0 %v2110_v0 }
  0x41   :  { %1630 = vmatpush3.msra.mxu1 %v2168_v1  ;;  %1615 = vmatpush3.msra.mxu0 %v2247_v21 }
  0x42   :  { %1631 = vmatprep.subr.mxu1 %v2110_v0  ;;  %1616 = vmatprep.subr.mxu0 %v2110_v0 }
  0x43   :  { %1632 = vmatpush3.msra.mxu1 %v2170_v2  ;;  %1617 = vmatpush3.msra.mxu0 %v2253_v22 }
  0x44   :  { %1633 = vmatprep.subr.mxu1 %v2110_v0  ;;  %1618 = vmatprep.subr.mxu0 %v2110_v0 }
  0x45   :  { %1634 = vmatpush3.msra.mxu1 %v2174_v3  ;;  %1619 = vmatpush3.msra.mxu0 %v2259_v23 }
  0x46   :  { %1635 = vmatprep.subr.mxu1 %v2110_v0  ;;  %1620 = vmatprep.subr.mxu0 %v2110_v0 }
  0x47   :  { %1636 = vmatpush3.msra.mxu1 %v2184_v6  ;;  %1621 = vmatpush3.msra.mxu0 %v2265_v24 }
  0x48   :  { %1637 = vmatprep.subr.mxu1 %v2110_v0  ;;  %1622 = vmatprep.subr.mxu0 %v2110_v0 }
  0x49   :  { %1638 = vmatpush3.msra.mxu1 %v2194_v9  ;;  %1623 = vmatpush3.msra.mxu0 %v2271_v25 }
  0x4a   :  { %1639 = vmatprep.subr.mxu1 %v2110_v0  ;;  %1624 = vmatprep.subr.mxu0 %v2110_v0 }
  0x4b   :  { %1640 = vmatpush3.msra.mxu1 %v2202_v11  ;;  %1625 = vmatpush3.msra.mxu0 %v2277_v26 }
  0x4c   :  { %1641 = vmatprep.subr.mxu1 %v2110_v0  ;;  %1661 = vmatprep.mubr.msk.f32.mxu1 %vm2111_vm0, %v2110_v0 }
  0x4d   :  { %1642 = vmatpush3.msra.mxu1 %v2211_v13  ;;  %1664 = vmatprep.subr.mxu0 %v2110_v0 }
  0x4e   :  { %1643 = vmatprep.subr.mxu1 %v2110_v0 }
  0x4f   :  { %1644 = vmatpush3.msra.mxu1 %v2220_v15 }
  0x50   :  { %1645 = vmatprep.subr.mxu1 %v2110_v0 }
  0x51   :  { %1646 = vmatpush3.msra.mxu1 %v2229_v17 }
  0x52   :  { %1647 = vmatprep.subr.mxu1 %v2110_v0 }
  0x53   :  { %1648 = vmatpush3.msra.mxu1 %v2238_v19 }
  0x54   :  { %1649 = vmatprep.subr.mxu1 %v2110_v0 }
  0x55   :  { %1650 = vmatpush3.msra.mxu1 %v2247_v21 }
  0x56   :  { %1651 = vmatprep.subr.mxu1 %v2110_v0 }
  0x57   :  { %1652 = vmatpush3.msra.mxu1 %v2253_v22 }
  0x58   :  { %1653 = vmatprep.subr.mxu1 %v2110_v0 }
  0x59   :  { %1654 = vmatpush3.msra.mxu1 %v2259_v23 }
  0x5a   :  { %1655 = vmatprep.subr.mxu1 %v2110_v0 }
  0x5b   :  { %1656 = vmatpush3.msra.mxu1 %v2265_v24 }
  0x5c   :  { %1657 = vmatprep.subr.mxu1 %v2110_v0 }
  0x5d   :  { %1658 = vmatpush3.msra.mxu1 %v2271_v25 }
  0x5e   :  { %1659 = vmatprep.subr.mxu1 %v2110_v0 }
  0x5f   :  { %1660 = vmatpush3.msra.mxu1 %v2277_v26 }
  0x60   :  { %1699 = vmatprep.subr.mxu1 %v2110_v0 }
  0xe5   :  { %v1549_v28 = vpop.f32.mrf.mxu0 }
  0xe6   :  { %v2345_v36 = vadd.f32 %v1549_v28, %v1370_v35 }
  0xe7   :  { %v166_v29 = vpop.f32.mrf.mxu0 }
  0xe8   :  { %v2347_v37 = vadd.f32 %v1370_v35, %v166_v29 }
  0xe9   :  { %v1552_v30 = vpop.f32.mrf.mxu0 }
  0xea   :  { %v2349_v38 = vadd.f32 %v1552_v30, %v1370_v35 }
  0xeb   :  { %v176_v31 = vpop.f32.mrf.mxu0 }
  0xec   :  { %v2351_v40 = vadd.f32 %v1370_v35, %v176_v31 }
  0xed   :  { %v1555_v32 = vpop.f32.mrf.mxu0 }
  0xee   :  { %v2353_v41 = vadd.f32 %v1555_v32, %v1370_v35 }
  0xef   :  { %v186_v33 = vpop.f32.mrf.mxu0 }
  0xf0   :  { %v2355_v42 = vadd.f32 %v1370_v35, %v186_v33 }
  0xf1   :  { %v1558_v34 = vpop.f32.mrf.mxu0 }
  0xf2   :  { %v2357_v43 = vadd.f32 %v1558_v34, %v1370_v35 }
  0xf3   :  { %v196_v39 = vpop.f32.mrf.mxu0 }
  0xf4   :  { %v2359_v49 = vadd.f32 %v1370_v35, %v196_v39 }
  0xfe   :  { %v288_v44 = vpop.f32.mrf.mxu1 }
  0xff   :  { %v293_v45 = vrot.slane %v288_v44, 1  ;;  %v294_v46 = vrot.slane %v288_v44, 2  ;;  %v295_v47 = vrot.slane %v288_v44, 3  ;;  %v296_v48 = vrot.slane %v288_v44, 4 }
 0x100   :  { %v297_v50 = vrot.slane %v288_v44, 5  ;;  %v308_v51 = vadd.f32 %v288_v44, %v2347_v37  ;;  %v1593_v52 = vpop.f32.mrf.mxu1  ;;  %v298_v53 = vrot.slane %v288_v44, 6  ;;  %v299_v57 = vrot.slane %v288_v44, 7 }
 0x101   :  { %v309_v54 = vadd.f32 %v293_v45, %v2345_v36  ;;  %v310_v55 = vadd.f32 %v294_v46, %v2351_v40  ;;  %v311_v56 = vadd.f32 %v295_v47, %v2349_v38  ;;  %v312_v58 = vadd.f32 %v296_v48, %v2355_v42 }
 0x102   :  { %1882 = vtanh.f32 %v308_v51  ;;  %v313_v59 = vadd.f32 %v297_v50, %v2353_v41  ;;  %v314_v60 = vadd.f32 %v298_v53, %v2359_v49  ;;  %v315_v61 = vadd.f32 %v299_v57, %v2357_v43 }
 0x103   :  { %1884 = vtanh.f32 %v309_v54 }
 0x104   :  { %1886 = vtanh.f32 %v310_v55 }
 0x105   :  { %1888 = vtanh.f32 %v311_v56 }
 0x106   :  { %1890 = vtanh.f32 %v312_v58 }
 0x107   :  { %1892 = vtanh.f32 %v313_v59 }
 0x108   :  { %1894 = vtanh.f32 %v314_v60 }
 0x109   :  { %1896 = vtanh.f32 %v315_v61 }
 0x10f   :  { %v1883_v62 = vpop.eup %1882 }
 0x110   :  { %v1885_v63 = vpop.eup %1884 }
 0x111   :  { %v1887_v4 = vpop.eup %1886  ;;  %v332_v5 = vrot.slane %v1885_v63, 7 }
 0x112   :  { %v1889_v7 = vpop.eup %1888  ;;  %v335_v8 = vrot.slane %v1887_v4, 6 }
 0x113   :  { %v1891_v10 = vpop.eup %1890  ;;  %v334_v12 = vsel %vm333_vm2, %v332_v5, %v1883_v62  ;;  %v338_v14 = vrot.slane %v1889_v7, 5 }
 0x114   :  { %v1893_v16 = vpop.eup %1892  ;;  %v337_v18 = vsel %vm336_vm3, %v335_v8, %v334_v12  ;;  %v341_v20 = vrot.slane %v1891_v10, 4 }
 0x115   :  { %v1895_v27 = vpop.eup %1894  ;;  %v340_v28 = vsel %vm339_vm4, %v338_v14, %v337_v18  ;;  %v344_v29 = vrot.slane %v1893_v16, 3 }
 0x116   :  { %v1897_v30 = vpop.eup %1896  ;;  %v343_v31 = vsel %vm342_vm5, %v341_v20, %v340_v28  ;;  %v347_v32 = vrot.slane %v1895_v27, 2 }
 0x117   :  { %v346_v33 = vsel %vm345_vm6, %v344_v29, %v343_v31  ;;  %v350_v34 = vrot.slane %v1897_v30, 1 }
 0x118   :  { %v349_v35 = vsel %vm348_vm7, %v347_v32, %v346_v33 }
 0x119   :  { %v352_v39 = vsel %vm351_vm8, %v350_v34, %v349_v35 }
 0x11a   :  { %1627 = vmatmul.mubr.f32.vlgmr.msra.gmra.mxu0 %v352_v39 }
 0x11b   :  { %1665 = vmatpush3.msra.mxu0 %v2168_v1  ;;  %1696 = vmatprep.mubr.msk.f32.mxu0 %vm2111_vm0, %v2110_v0 }
 0x11c   :  { %1666 = vmatprep.subr.mxu0 %v2110_v0 }
 0x11d   :  { %1667 = vmatpush3.msra.mxu0 %v2170_v2 }
 0x11e   :  { %1668 = vmatprep.subr.mxu0 %v2110_v0 }
 0x11f   :  { %1669 = vmatpush3.msra.mxu0 %v2174_v3 }
 0x120   :  { %1670 = vmatprep.subr.mxu0 %v2110_v0 }
 0x121   :  { %1671 = vmatpush3.msra.mxu0 %v2184_v6 }
 0x122   :  { %1672 = vmatprep.subr.mxu0 %v2110_v0 }
 0x123   :  { %1673 = vmatpush3.msra.mxu0 %v2194_v9 }
 0x124   :  { %1674 = vmatprep.subr.mxu0 %v2110_v0 }
 0x125   :  { %1675 = vmatpush3.msra.mxu0 %v2202_v11 }
 0x126   :  { %1676 = vmatprep.subr.mxu0 %v2110_v0 }
 0x127   :  { %1677 = vmatpush3.msra.mxu0 %v2211_v13 }
 0x128   :  { %1678 = vmatprep.subr.mxu0 %v2110_v0 }
 0x129   :  { %1679 = vmatpush3.msra.mxu0 %v2220_v15 }
 0x12a   :  { %1680 = vmatprep.subr.mxu0 %v2110_v0 }
 0x12b   :  { %1681 = vmatpush3.msra.mxu0 %v2229_v17 }
 0x12c   :  { %1682 = vmatprep.subr.mxu0 %v2110_v0 }
 0x12d   :  { %1683 = vmatpush3.msra.mxu0 %v2238_v19 }
 0x12e   :  { %1684 = vmatprep.subr.mxu0 %v2110_v0 }
 0x12f   :  { %1685 = vmatpush3.msra.mxu0 %v2247_v21 }
 0x130   :  { %1686 = vmatprep.subr.mxu0 %v2110_v0 }
 0x131   :  { %1687 = vmatpush3.msra.mxu0 %v2253_v22 }
 0x132   :  { %1688 = vmatprep.subr.mxu0 %v2110_v0 }
 0x133   :  { %1689 = vmatpush3.msra.mxu0 %v2259_v23 }
 0x134   :  { %1690 = vmatprep.subr.mxu0 %v2110_v0 }
 0x135   :  { %1691 = vmatpush3.msra.mxu0 %v2265_v24 }
 0x136   :  { %1692 = vmatprep.subr.mxu0 %v2110_v0 }
 0x137   :  { %1693 = vmatpush3.msra.mxu0 %v2271_v25 }
 0x138   :  { %1694 = vmatprep.subr.mxu0 %v2110_v0 }
 0x139   :  { %1695 = vmatpush3.msra.mxu0 %v2277_v26 }
 0x13a   :  { %1734 = vmatprep.subr.mxu0 %v2110_v0 }
 0x1da   :  { %v420_v44 = vpop.f32.mrf.mxu0 }
 0x1db   :  { %v425_v45 = vrot.slane %v420_v44, 7  ;;  %v426_v46 = vrot.slane %v420_v44, 1  ;;  %v427_v47 = vrot.slane %v420_v44, 2  ;;  %v428_v48 = vrot.slane %v420_v44, 3 }
 0x1dc   :  { %v441_v50 = vadd.f32 %v420_v44, %v2345_v36  ;;  %v1628_v51 = vpop.f32.mrf.mxu0  ;;  %v429_v52 = vrot.slane %v420_v44, 4  ;;  %v430_v53 = vrot.slane %v420_v44, 5  ;;  %v431_v56 = vrot.slane %v420_v44, 6 }
 0x1dd   :  { %v440_v54 = vadd.f32 %v425_v45, %v2347_v37  ;;  %v442_v55 = vadd.f32 %v426_v46, %v2351_v40  ;;  %v443_v57 = vadd.f32 %v427_v47, %v2349_v38  ;;  %v444_v58 = vadd.f32 %v428_v48, %v2355_v42 }
 0x1de   :  { %1898 = vtanh.f32 %v441_v50  ;;  %v445_v59 = vadd.f32 %v429_v52, %v2353_v41  ;;  %v446_v60 = vadd.f32 %v430_v53, %v2359_v49  ;;  %v447_v61 = vadd.f32 %v431_v56, %v2357_v43 }
 0x1df   :  { %1900 = vtanh.f32 %v440_v54 }
 0x1e0   :  { %1902 = vtanh.f32 %v442_v55 }
 0x1e1   :  { %1904 = vtanh.f32 %v443_v57 }
 0x1e2   :  { %1906 = vtanh.f32 %v444_v58 }
 0x1e3   :  { %1908 = vtanh.f32 %v445_v59 }
 0x1e4   :  { %1910 = vtanh.f32 %v446_v60 }
 0x1e5   :  { %1912 = vtanh.f32 %v447_v61 }
 0x1eb   :  { %v1899_v62 = vpop.eup %1898 }
 0x1ec   :  { %v1901_v63 = vpop.eup %1900 }
 0x1ed   :  { %v1903_v4 = vpop.eup %1902  ;;  %v464_v5 = vrot.slane %v1901_v63, 1 }
 0x1ee   :  { %v1905_v7 = vpop.eup %1904  ;;  %v466_v8 = vrot.slane %v1903_v4, 7 }
 0x1ef   :  { %v1907_v10 = vpop.eup %1906  ;;  %v465_v12 = vsel %vm333_vm2, %v1899_v62, %v464_v5  ;;  %v468_v14 = vrot.slane %v1905_v7, 6 }
 0x1f0   :  { %v1909_v16 = vpop.eup %1908  ;;  %v467_v18 = vsel %vm336_vm3, %v466_v8, %v465_v12  ;;  %v470_v20 = vrot.slane %v1907_v10, 5 }
 0x1f1   :  { %v1911_v27 = vpop.eup %1910  ;;  %v469_v28 = vsel %vm339_vm4, %v468_v14, %v467_v18  ;;  %v472_v29 = vrot.slane %v1909_v16, 4 }
 0x1f2   :  { %v1913_v30 = vpop.eup %1912  ;;  %v471_v31 = vsel %vm342_vm5, %v470_v20, %v469_v28  ;;  %v474_v32 = vrot.slane %v1911_v27, 3 }
 0x1f3   :  { %v473_v33 = vsel %vm345_vm6, %v472_v29, %v471_v31  ;;  %v476_v34 = vrot.slane %v1913_v30, 2 }
 0x1f4   :  { %v475_v35 = vsel %vm348_vm7, %v474_v32, %v473_v33 }
 0x1f5   :  { %v477_v39 = vsel %vm351_vm8, %v476_v34, %v475_v35 }
 0x1f6   :  { %1662 = vmatmul.mubr.f32.vlgmr.msra.gmra.mxu1 %v477_v39 }
 0x1f7   :  { %1700 = vmatpush3.msra.mxu1 %v2168_v1  ;;  %1731 = vmatprep.mubr.msk.f32.mxu1 %vm2111_vm0, %v2110_v0 }
 0x1f8   :  { %1701 = vmatprep.subr.mxu1 %v2110_v0 }
 0x1f9   :  { %1702 = vmatpush3.msra.mxu1 %v2170_v2 }
 0x1fa   :  { %1703 = vmatprep.subr.mxu1 %v2110_v0 }
 0x1fb   :  { %1704 = vmatpush3.msra.mxu1 %v2174_v3 }
 0x1fc   :  { %1705 = vmatprep.subr.mxu1 %v2110_v0 }
 0x1fd   :  { %1706 = vmatpush3.msra.mxu1 %v2184_v6 }
 0x1fe   :  { %1707 = vmatprep.subr.mxu1 %v2110_v0 }
 0x1ff   :  { %1708 = vmatpush3.msra.mxu1 %v2194_v9 }
 0x200   :  { %1709 = vmatprep.subr.mxu1 %v2110_v0 }
 0x201   :  { %1710 = vmatpush3.msra.mxu1 %v2202_v11 }
 0x202   :  { %1711 = vmatprep.subr.mxu1 %v2110_v0 }
 0x203   :  { %1712 = vmatpush3.msra.mxu1 %v2211_v13 }
 0x204   :  { %1713 = vmatprep.subr.mxu1 %v2110_v0 }
 0x205   :  { %1714 = vmatpush3.msra.mxu1 %v2220_v15 }
 0x206   :  { %1715 = vmatprep.subr.mxu1 %v2110_v0 }
 0x207   :  { %1716 = vmatpush3.msra.mxu1 %v2229_v17 }
 0x208   :  { %1717 = vmatprep.subr.mxu1 %v2110_v0 }
 0x209   :  { %1718 = vmatpush3.msra.mxu1 %v2238_v19 }
 0x20a   :  { %1719 = vmatprep.subr.mxu1 %v2110_v0 }
 0x20b   :  { %1720 = vmatpush3.msra.mxu1 %v2247_v21 }
 0x20c   :  { %1721 = vmatprep.subr.mxu1 %v2110_v0 }
 0x20d   :  { %1722 = vmatpush3.msra.mxu1 %v2253_v22 }
 0x20e   :  { %1723 = vmatprep.subr.mxu1 %v2110_v0 }
 0x20f   :  { %1724 = vmatpush3.msra.mxu1 %v2259_v23 }
 0x210   :  { %1725 = vmatprep.subr.mxu1 %v2110_v0 }
 0x211   :  { %1726 = vmatpush3.msra.mxu1 %v2265_v24 }
 0x212   :  { %1727 = vmatprep.subr.mxu1 %v2110_v0 }
 0x213   :  { %1728 = vmatpush3.msra.mxu1 %v2271_v25 }
 0x214   :  { %1729 = vmatprep.subr.mxu1 %v2110_v0 }
 0x215   :  { %1730 = vmatpush3.msra.mxu1 %v2277_v26 }
 0x216   :  { %1769 = vmatprep.subr.mxu1 %v2110_v0 }
 0x2b6   :  { %v545_v44 = vpop.f32.mrf.mxu1 }
 0x2b7   :  { %v550_v45 = vrot.slane %v545_v44, 6  ;;  %v551_v46 = vrot.slane %v545_v44, 7  ;;  %v552_v47 = vrot.slane %v545_v44, 1  ;;  %v553_v48 = vrot.slane %v545_v44, 2 }
 0x2b8   :  { %v567_v50 = vadd.f32 %v545_v44, %v2351_v40  ;;  %v1663_v51 = vpop.f32.mrf.mxu1  ;;  %v554_v52 = vrot.slane %v545_v44, 3  ;;  %v555_v53 = vrot.slane %v545_v44, 4  ;;  %v556_v56 = vrot.slane %v545_v44, 5 }
 0x2b9   :  { %v565_v54 = vadd.f32 %v550_v45, %v2347_v37  ;;  %v566_v55 = vadd.f32 %v551_v46, %v2345_v36  ;;  %v568_v57 = vadd.f32 %v552_v47, %v2349_v38  ;;  %v569_v58 = vadd.f32 %v553_v48, %v2355_v42 }
 0x2ba   :  { %1914 = vtanh.f32 %v567_v50  ;;  %v570_v59 = vadd.f32 %v554_v52, %v2353_v41  ;;  %v571_v60 = vadd.f32 %v555_v53, %v2359_v49  ;;  %v572_v61 = vadd.f32 %v556_v56, %v2357_v43 }
 0x2bb   :  { %1916 = vtanh.f32 %v565_v54 }
 0x2bc   :  { %1918 = vtanh.f32 %v566_v55 }
 0x2bd   :  { %1920 = vtanh.f32 %v568_v57 }
 0x2be   :  { %1922 = vtanh.f32 %v569_v58 }
 0x2bf   :  { %1924 = vtanh.f32 %v570_v59 }
 0x2c0   :  { %1926 = vtanh.f32 %v571_v60 }
 0x2c1   :  { %1928 = vtanh.f32 %v572_v61 }
 0x2c7   :  { %v1915_v62 = vpop.eup %1914 }
 0x2c8   :  { %v1917_v63 = vpop.eup %1916 }
 0x2c9   :  { %v1919_v4 = vpop.eup %1918  ;;  %v589_v5 = vrot.slane %v1917_v63, 2 }
 0x2ca   :  { %v1921_v7 = vpop.eup %1920  ;;  %v590_v8 = vrot.slane %v1919_v4, 1 }
 0x2cb   :  { %v1923_v10 = vpop.eup %1922  ;;  %v593_v16 = vrot.slane %v1921_v7, 7 }
 0x2cc   :  { %v1925_v12 = vpop.eup %1924  ;;  %v591_v14 = vsel %vm333_vm2, %v590_v8, %v589_v5  ;;  %v595_v27 = vrot.slane %v1923_v10, 6 }
 0x2cd   :  { %v1927_v18 = vpop.eup %1926  ;;  %v592_v20 = vsel %vm336_vm3, %v1915_v62, %v591_v14  ;;  %v597_v30 = vrot.slane %v1925_v12, 5 }
 0x2ce   :  { %v1929_v28 = vpop.eup %1928  ;;  %v594_v29 = vsel %vm339_vm4, %v593_v16, %v592_v20  ;;  %v599_v32 = vrot.slane %v1927_v18, 4 }
 0x2cf   :  { %v596_v31 = vsel %vm342_vm5, %v595_v27, %v594_v29  ;;  %v601_v34 = vrot.slane %v1929_v28, 3 }
 0x2d0   :  { %v598_v33 = vsel %vm345_vm6, %v597_v30, %v596_v31 }
 0x2d1   :  { %v600_v35 = vsel %vm348_vm7, %v599_v32, %v598_v33 }
 0x2d2   :  { %v602_v39 = vsel %vm351_vm8, %v601_v34, %v600_v35 }
 0x2d3   :  { %1697 = vmatmul.mubr.f32.vlgmr.msra.gmra.mxu0 %v602_v39 }
 0x2d4   :  { %1735 = vmatpush3.msra.mxu0 %v2168_v1  ;;  %1766 = vmatprep.mubr.msk.f32.mxu0 %vm2111_vm0, %v2110_v0 }
 0x2d5   :  { %1736 = vmatprep.subr.mxu0 %v2110_v0 }
 0x2d6   :  { %1737 = vmatpush3.msra.mxu0 %v2170_v2 }
 0x2d7   :  { %1738 = vmatprep.subr.mxu0 %v2110_v0 }
 0x2d8   :  { %1739 = vmatpush3.msra.mxu0 %v2174_v3 }
 0x2d9   :  { %1740 = vmatprep.subr.mxu0 %v2110_v0 }
 0x2da   :  { %1741 = vmatpush3.msra.mxu0 %v2184_v6 }
 0x2db   :  { %1742 = vmatprep.subr.mxu0 %v2110_v0 }
 0x2dc   :  { %1743 = vmatpush3.msra.mxu0 %v2194_v9 }
 0x2dd   :  { %1744 = vmatprep.subr.mxu0 %v2110_v0 }
 0x2de   :  { %1745 = vmatpush3.msra.mxu0 %v2202_v11 }
 0x2df   :  { %1746 = vmatprep.subr.mxu0 %v2110_v0 }
 0x2e0   :  { %1747 = vmatpush3.msra.mxu0 %v2211_v13 }
 0x2e1   :  { %1748 = vmatprep.subr.mxu0 %v2110_v0 }
 0x2e2   :  { %1749 = vmatpush3.msra.mxu0 %v2220_v15 }
 0x2e3   :  { %1750 = vmatprep.subr.mxu0 %v2110_v0 }
 0x2e4   :  { %1751 = vmatpush3.msra.mxu0 %v2229_v17 }
 0x2e5   :  { %1752 = vmatprep.subr.mxu0 %v2110_v0 }
 0x2e6   :  { %1753 = vmatpush3.msra.mxu0 %v2238_v19 }
 0x2e7   :  { %1754 = vmatprep.subr.mxu0 %v2110_v0 }
 0x2e8   :  { %1755 = vmatpush3.msra.mxu0 %v2247_v21 }
 0x2e9   :  { %1756 = vmatprep.subr.mxu0 %v2110_v0 }
 0x2ea   :  { %1757 = vmatpush3.msra.mxu0 %v2253_v22 }
 0x2eb   :  { %1758 = vmatprep.subr.mxu0 %v2110_v0 }
 0x2ec   :  { %1759 = vmatpush3.msra.mxu0 %v2259_v23 }
 0x2ed   :  { %1760 = vmatprep.subr.mxu0 %v2110_v0 }
 0x2ee   :  { %1761 = vmatpush3.msra.mxu0 %v2265_v24 }
 0x2ef   :  { %1762 = vmatprep.subr.mxu0 %v2110_v0 }
 0x2f0   :  { %1763 = vmatpush3.msra.mxu0 %v2271_v25 }
 0x2f1   :  { %1764 = vmatprep.subr.mxu0 %v2110_v0 }
 0x2f2   :  { %1765 = vmatpush3.msra.mxu0 %v2277_v26 }
 0x2f3   :  { %1804 = vmatprep.subr.mxu0 %v2110_v0 }
 0x393   :  { %v670_v44 = vpop.f32.mrf.mxu0 }
 0x394   :  { %v675_v45 = vrot.slane %v670_v44, 5  ;;  %v676_v46 = vrot.slane %v670_v44, 6  ;;  %v677_v47 = vrot.slane %v670_v44, 7  ;;  %v678_v48 = vrot.slane %v670_v44, 1 }
 0x395   :  { %v693_v50 = vadd.f32 %v670_v44, %v2349_v38  ;;  %v1698_v51 = vpop.f32.mrf.mxu0  ;;  %v679_v52 = vrot.slane %v670_v44, 2  ;;  %v680_v53 = vrot.slane %v670_v44, 3  ;;  %v681_v57 = vrot.slane %v670_v44, 4 }
 0x396   :  { %v690_v54 = vadd.f32 %v675_v45, %v2347_v37  ;;  %v691_v55 = vadd.f32 %v676_v46, %v2345_v36  ;;  %v692_v56 = vadd.f32 %v677_v47, %v2351_v40  ;;  %v694_v58 = vadd.f32 %v678_v48, %v2355_v42 }
 0x397   :  { %1930 = vtanh.f32 %v693_v50  ;;  %v695_v59 = vadd.f32 %v679_v52, %v2353_v41  ;;  %v696_v60 = vadd.f32 %v680_v53, %v2359_v49  ;;  %v697_v61 = vadd.f32 %v681_v57, %v2357_v43 }
 0x398   :  { %1932 = vtanh.f32 %v690_v54 }
 0x399   :  { %1934 = vtanh.f32 %v691_v55 }
 0x39a   :  { %1936 = vtanh.f32 %v692_v56 }
 0x39b   :  { %1938 = vtanh.f32 %v694_v58 }
 0x39c   :  { %1940 = vtanh.f32 %v695_v59 }
 0x39d   :  { %1942 = vtanh.f32 %v696_v60 }
 0x39e   :  { %1944 = vtanh.f32 %v697_v61 }
 0x3a4   :  { %v1931_v62 = vpop.eup %1930 }
 0x3a5   :  { %v1933_v63 = vpop.eup %1932 }
 0x3a6   :  { %v1935_v4 = vpop.eup %1934  ;;  %v714_v5 = vrot.slane %v1933_v63, 3 }
 0x3a7   :  { %v1937_v7 = vpop.eup %1936  ;;  %v715_v8 = vrot.slane %v1935_v4, 2 }
 0x3a8   :  { %v1939_v10 = vpop.eup %1938  ;;  %v717_v12 = vrot.slane %v1937_v7, 1 }
 0x3a9   :  { %v1941_v14 = vpop.eup %1940  ;;  %v716_v16 = vsel %vm333_vm2, %v715_v8, %v714_v5  ;;  %v720_v27 = vrot.slane %v1939_v10, 7 }
 0x3aa   :  { %v1943_v18 = vpop.eup %1942  ;;  %v718_v20 = vsel %vm336_vm3, %v717_v12, %v716_v16  ;;  %v722_v30 = vrot.slane %v1941_v14, 6 }
 0x3ab   :  { %v1945_v28 = vpop.eup %1944  ;;  %v719_v29 = vsel %vm339_vm4, %v1931_v62, %v718_v20  ;;  %v724_v32 = vrot.slane %v1943_v18, 5 }
 0x3ac   :  { %v721_v31 = vsel %vm342_vm5, %v720_v27, %v719_v29  ;;  %v726_v34 = vrot.slane %v1945_v28, 4  ;;  %v2010_v29 = vld [vmem:[#allocation2 + $0x78] sm:$0xff] }
 0x3ad   :  { %v723_v33 = vsel %vm345_vm6, %v722_v30, %v721_v31  ;;  %v2011_v30 = vld [vmem:[#allocation2 + $0x70] sm:$0xff]  ;;  %v2012_v31 = vld [vmem:[#allocation2 + $0x68] sm:$0xff] }
 0x3ae   :  { %v725_v35 = vsel %vm348_vm7, %v724_v32, %v723_v33  ;;  %v2013_v32 = vld [vmem:[#allocation2 + $0x60] sm:$0xff]  ;;  %v2014_v33 = vld [vmem:[#allocation2 + $0x58] sm:$0xff] }
 0x3af   :  { %v727_v39 = vsel %vm351_vm8, %v726_v34, %v725_v35  ;;  %v2015_v34 = vld [vmem:[#allocation2 + $0x50] sm:$0xff]  ;;  %v2016_v35 = vld [vmem:[#allocation2 + $0x48] sm:$0xff] }
 0x3b0   :  { %1732 = vmatmul.mubr.f32.vlgmr.msra.gmra.mxu1 %v727_v39  ;;  %v2017_v39 = vld [vmem:[#allocation2 + $0x40] sm:$0xff] }
 0x3b1   :  { %1770 = vmatpush3.msra.mxu1 %v2168_v1  ;;  %1801 = vmatprep.mubr.msk.f32.mxu1 %vm2111_vm0, %v2110_v0 }
 0x3b2   :  { %1771 = vmatprep.subr.mxu1 %v2110_v0 }
 0x3b3   :  { %1772 = vmatpush3.msra.mxu1 %v2170_v2 }
 0x3b4   :  { %1773 = vmatprep.subr.mxu1 %v2110_v0 }
 0x3b5   :  { %1774 = vmatpush3.msra.mxu1 %v2174_v3 }
 0x3b6   :  { %1775 = vmatprep.subr.mxu1 %v2110_v0 }
 0x3b7   :  { %1776 = vmatpush3.msra.mxu1 %v2184_v6 }
 0x3b8   :  { %1777 = vmatprep.subr.mxu1 %v2110_v0 }
 0x3b9   :  { %1778 = vmatpush3.msra.mxu1 %v2194_v9 }
 0x3ba   :  { %1779 = vmatprep.subr.mxu1 %v2110_v0 }
 0x3bb   :  { %1780 = vmatpush3.msra.mxu1 %v2202_v11 }
 0x3bc   :  { %1781 = vmatprep.subr.mxu1 %v2110_v0 }
 0x3bd   :  { %1782 = vmatpush3.msra.mxu1 %v2211_v13 }
 0x3be   :  { %1783 = vmatprep.subr.mxu1 %v2110_v0 }
 0x3bf   :  { %1784 = vmatpush3.msra.mxu1 %v2220_v15 }
 0x3c0   :  { %1785 = vmatprep.subr.mxu1 %v2110_v0 }
 0x3c1   :  { %1786 = vmatpush3.msra.mxu1 %v2229_v17 }
 0x3c2   :  { %1787 = vmatprep.subr.mxu1 %v2110_v0 }
 0x3c3   :  { %1788 = vmatpush3.msra.mxu1 %v2238_v19 }
 0x3c4   :  { %1789 = vmatprep.subr.mxu1 %v2110_v0 }
 0x3c5   :  { %1790 = vmatpush3.msra.mxu1 %v2247_v21 }
 0x3c6   :  { %1791 = vmatprep.subr.mxu1 %v2110_v0 }
 0x3c7   :  { %1792 = vmatpush3.msra.mxu1 %v2253_v22 }
 0x3c8   :  { %1793 = vmatprep.subr.mxu1 %v2110_v0 }
 0x3c9   :  { %1794 = vmatpush3.msra.mxu1 %v2259_v23 }
 0x3ca   :  { %1795 = vmatprep.subr.mxu1 %v2110_v0 }
 0x3cb   :  { %1796 = vmatpush3.msra.mxu1 %v2265_v24 }
 0x3cc   :  { %1797 = vmatprep.subr.mxu1 %v2110_v0 }
 0x3cd   :  { %1798 = vmatpush3.msra.mxu1 %v2271_v25 }
 0x3ce   :  { %1799 = vmatprep.subr.mxu1 %v2110_v0 }
 0x3cf   :  { %1800 = vmatpush3.msra.mxu1 %v2277_v26 }
 0x3d0   :  { %1839 = vmatprep.subr.mxu1 %v2110_v0 }
 0x470   :  { %v795_v1 = vpop.f32.mrf.mxu1 }
 0x471   :  { %v800_v2 = vrot.slane %v795_v1, 4  ;;  %v801_v3 = vrot.slane %v795_v1, 5  ;;  %v802_v6 = vrot.slane %v795_v1, 6  ;;  %v803_v9 = vrot.slane %v795_v1, 7 }
 0x472   :  { %v819_v11 = vadd.f32 %v795_v1, %v2355_v42  ;;  %v1733_v13 = vpop.f32.mrf.mxu1  ;;  %v804_v15 = vrot.slane %v795_v1, 1  ;;  %v805_v44 = vrot.slane %v795_v1, 2  ;;  %v806_v48 = vrot.slane %v795_v1, 3 }
 0x473   :  { %v815_v45 = vadd.f32 %v800_v2, %v2347_v37  ;;  %v816_v46 = vadd.f32 %v801_v3, %v2345_v36  ;;  %v817_v47 = vadd.f32 %v802_v6, %v2351_v40  ;;  %v818_v50 = vadd.f32 %v803_v9, %v2349_v38 }
 0x474   :  { %1946 = vtanh.f32 %v819_v11  ;;  %v820_v51 = vadd.f32 %v804_v15, %v2353_v41  ;;  %v821_v52 = vadd.f32 %v805_v44, %v2359_v49  ;;  %v822_v53 = vadd.f32 %v806_v48, %v2357_v43 }
 0x475   :  { %1948 = vtanh.f32 %v815_v45 }
 0x476   :  { %1950 = vtanh.f32 %v816_v46 }
 0x477   :  { %1952 = vtanh.f32 %v817_v47 }
 0x478   :  { %1954 = vtanh.f32 %v818_v50 }
 0x479   :  { %1956 = vtanh.f32 %v820_v51 }
 0x47a   :  { %1958 = vtanh.f32 %v821_v52 }
 0x47b   :  { %1960 = vtanh.f32 %v822_v53 }
 0x481   :  { %v1947_v54 = vpop.eup %1946 }
 0x482   :  { %v1949_v55 = vpop.eup %1948 }
 0x483   :  { %v1951_v56 = vpop.eup %1950  ;;  %v839_v57 = vrot.slane %v1949_v55, 4 }
 0x484   :  { %v1953_v58 = vpop.eup %1952  ;;  %v840_v59 = vrot.slane %v1951_v56, 3 }
 0x485   :  { %v1955_v60 = vpop.eup %1954  ;;  %v842_v61 = vrot.slane %v1953_v58, 2 }
 0x486   :  { %v1957_v62 = vpop.eup %1956  ;;  %v841_v63 = vsel %vm333_vm2, %v840_v59, %v839_v57  ;;  %v844_v4 = vrot.slane %v1955_v60, 1 }
 0x487   :  { %v1959_v5 = vpop.eup %1958  ;;  %v843_v7 = vsel %vm336_vm3, %v842_v61, %v841_v63  ;;  %v847_v12 = vrot.slane %v1957_v62, 7 }
 0x488   :  { %v1961_v8 = vpop.eup %1960  ;;  %v845_v10 = vsel %vm339_vm4, %v844_v4, %v843_v7  ;;  %v849_v16 = vrot.slane %v1959_v5, 6 }
 0x489   :  { %v846_v14 = vsel %vm342_vm5, %v1947_v54, %v845_v10  ;;  %v851_v20 = vrot.slane %v1961_v8, 5  ;;  %v1221_v10 = vld [vmem:[#allocation5 + $0x78] sm:$0xff] }
 0x48a   :  { %v848_v18 = vsel %vm345_vm6, %v847_v12, %v846_v14  ;;  %v1220_v12 = vld [vmem:[#allocation5 + $0x70] sm:$0xff] }
 0x48b   :  { %v850_v27 = vsel %vm348_vm7, %v849_v16, %v848_v18 }
 0x48c   :  { %v852_v28 = vsel %vm351_vm8, %v851_v20, %v850_v27 }
 0x48d   :  { %1767 = vmatmul.mubr.f32.vlgmr.msra.gmra.mxu0 %v852_v28 }
 0x48e   :  { %1805 = vmatpush3.msra.mxu0 %v2010_v29  ;;  %1836 = vmatprep.mubr.msk.f32.mxu0 %vm2111_vm0, %v2110_v0 }
 0x48f   :  { %1806 = vmatprep.subr.mxu0 %v2110_v0 }
 0x490   :  { %1807 = vmatpush3.msra.mxu0 %v2011_v30 }
 0x491   :  { %1808 = vmatprep.subr.mxu0 %v2110_v0 }
 0x492   :  { %1809 = vmatpush3.msra.mxu0 %v2012_v31 }
 0x493   :  { %1810 = vmatprep.subr.mxu0 %v2110_v0 }
 0x494   :  { %1811 = vmatpush3.msra.mxu0 %v2013_v32 }
 0x495   :  { %1812 = vmatprep.subr.mxu0 %v2110_v0 }
 0x496   :  { %1813 = vmatpush3.msra.mxu0 %v2014_v33 }
 0x497   :  { %1814 = vmatprep.subr.mxu0 %v2110_v0 }
 0x498   :  { %1815 = vmatpush3.msra.mxu0 %v2015_v34 }
 0x499   :  { %1816 = vmatprep.subr.mxu0 %v2110_v0 }
 0x49a   :  { %1817 = vmatpush3.msra.mxu0 %v2016_v35 }
 0x49b   :  { %1818 = vmatprep.subr.mxu0 %v2110_v0 }
 0x49c   :  { %1819 = vmatpush3.msra.mxu0 %v2017_v39 }
 0x49d   :  { %1820 = vmatprep.subr.mxu0 %v2110_v0 }
 0x49e   :  { %1821 = vmatpush3.msra.mxu0 %v2229_v17 }
 0x49f   :  { %1822 = vmatprep.subr.mxu0 %v2110_v0 }
 0x4a0   :  { %1823 = vmatpush3.msra.mxu0 %v2238_v19 }
 0x4a1   :  { %1824 = vmatprep.subr.mxu0 %v2110_v0 }
 0x4a2   :  { %1825 = vmatpush3.msra.mxu0 %v2247_v21 }
 0x4a3   :  { %1826 = vmatprep.subr.mxu0 %v2110_v0 }
 0x4a4   :  { %1827 = vmatpush3.msra.mxu0 %v2253_v22 }
 0x4a5   :  { %1828 = vmatprep.subr.mxu0 %v2110_v0 }
 0x4a6   :  { %1829 = vmatpush3.msra.mxu0 %v2259_v23 }
 0x4a7   :  { %1830 = vmatprep.subr.mxu0 %v2110_v0 }
 0x4a8   :  { %1831 = vmatpush3.msra.mxu0 %v2265_v24 }
 0x4a9   :  { %1832 = vmatprep.subr.mxu0 %v2110_v0 }
 0x4aa   :  { %1833 = vmatpush3.msra.mxu0 %v2271_v25 }
 0x4ab   :  { %1834 = vmatprep.subr.mxu0 %v2110_v0 }
 0x4ac   :  { %1835 = vmatpush3.msra.mxu0 %v2277_v26 }
 0x54d   :  { %v920_v17 = vpop.f32.mrf.mxu0 }
 0x54e   :  { %v925_v19 = vrot.slane %v920_v17, 3  ;;  %v926_v21 = vrot.slane %v920_v17, 4  ;;  %v927_v22 = vrot.slane %v920_v17, 5  ;;  %v928_v1 = vrot.slane %v920_v17, 6 }
 0x54f   :  { %v929_v2 = vrot.slane %v920_v17, 7  ;;  %v1768_v3 = vpop.f32.mrf.mxu0  ;;  %v930_v23 = vrot.slane %v920_v17, 1  ;;  %v931_v11 = vrot.slane %v920_v17, 2  ;;  %v945_v44 = vadd.f32 %v920_v17, %v2353_v41 }
 0x550   :  { %v940_v6 = vadd.f32 %v925_v19, %v2347_v37  ;;  %v941_v24 = vadd.f32 %v926_v21, %v2345_v36  ;;  %v942_v9 = vadd.f32 %v927_v22, %v2351_v40  ;;  %v943_v25 = vadd.f32 %v928_v1, %v2349_v38 }
 0x551   :  { %v944_v26 = vadd.f32 %v929_v2, %v2355_v42  ;;  %v946_v13 = vadd.f32 %v930_v23, %v2359_v49  ;;  %v947_v15 = vadd.f32 %v931_v11, %v2357_v43 }
 0x552   :  { %1962 = vtanh.f32 %v940_v6 }
 0x553   :  { %1964 = vtanh.f32 %v941_v24 }
 0x554   :  { %1966 = vtanh.f32 %v942_v9 }
 0x555   :  { %1968 = vtanh.f32 %v943_v25 }
 0x556   :  { %1970 = vtanh.f32 %v944_v26 }
 0x557   :  { %1972 = vtanh.f32 %v946_v13 }
 0x558   :  { %1974 = vtanh.f32 %v947_v15 }
 0x559   :  { %1976 = vtanh.f32 %v945_v44 }
 0x55f   :  { %v1963_v45 = vpop.eup %1962 }
 0x560   :  { %v1965_v46 = vpop.eup %1964  ;;  %v964_v47 = vrot.slane %v1963_v45, 5 }
 0x561   :  { %v1967_v48 = vpop.eup %1966  ;;  %v965_v50 = vrot.slane %v1965_v46, 4 }
 0x562   :  { %v1969_v51 = vpop.eup %1968  ;;  %v967_v52 = vrot.slane %v1967_v48, 3 }
 0x563   :  { %v1971_v53 = vpop.eup %1970  ;;  %v966_v54 = vsel %vm333_vm2, %v965_v50, %v964_v47  ;;  %v969_v55 = vrot.slane %v1969_v51, 2 }
 0x564   :  { %v1973_v56 = vpop.eup %1972  ;;  %v968_v57 = vsel %vm336_vm3, %v967_v52, %v966_v54  ;;  %v971_v58 = vrot.slane %v1971_v53, 1  ;;  %v1219_v54 = vld [vmem:[#allocation5 + $0x68] sm:$0xff] }
 0x565   :  { %v1975_v59 = vpop.eup %1974  ;;  %v970_v60 = vsel %vm339_vm4, %v969_v55, %v968_v57  ;;  %v974_v63 = vrot.slane %v1973_v56, 7  ;;  %v1218_v55 = vld [vmem:[#allocation5 + $0x60] sm:$0xff]  ;;  %v1217_v56 = vld [vmem:[#allocation5 + $0x58] sm:$0xff]  ;;  %v1216_v57 = vld [vmem:[#allocation5 + $0x50] sm:$0xff] }
 0x566   :  { %v1977_v61 = vpop.eup %1976  ;;  %v972_v62 = vsel %vm342_vm5, %v971_v58, %v970_v60  ;;  %v976_v5 = vrot.slane %v1975_v59, 6  ;;  %v1215_v58 = vld [vmem:[#allocation5 + $0x48] sm:$0xff]  ;;  %v1214_v59 = vld [vmem:[#allocation5 + $0x40] sm:$0xff]  ;;  %v1213_v60 = vld [vmem:[#allocation5 + $0x38] sm:$0xff] }
 0x567   :  { %v973_v4 = vsel %vm345_vm6, %v1977_v61, %v972_v62  ;;  %v1212_v61 = vld [vmem:[#allocation5 + $0x30] sm:$0xff]  ;;  %v1211_v62 = vld [vmem:[#allocation5 + $0x28] sm:$0xff] }
 0x568   :  { %v975_v7 = vsel %vm348_vm7, %v974_v63, %v973_v4  ;;  %v1210_v63 = vld [vmem:[#allocation5 + $0x20] sm:$0xff]  ;;  %v1209_v4 = vld [vmem:[#allocation5 + $0x18] sm:$0xff] }
 0x569   :  { %v977_v8 = vsel %vm351_vm8, %v976_v5, %v975_v7  ;;  %v1208_v5 = vld [vmem:[#allocation5 + $0x10] sm:$0xff]  ;;  %v1207_v7 = vld [vmem:[#allocation5 + $0x8] sm:$0xff] }
 0x56a   :  { %1802 = vmatmul.mubr.f32.vlgmr.msra.gmra.mxu1 %v977_v8  ;;  %v1206_v8 = vld [vmem:[#allocation5] sm:$0xff] }
 0x56b   :  { %1871 = vmatprep.mubr.msk.f32.mxu1 %vm2111_vm0, %v2110_v0  ;;  %1840 = vmatpush3.msra.mxu1 %v1221_v10 }
 0x56c   :  { %1841 = vmatprep.subr.mxu1 %v2110_v0 }
 0x56d   :  { %1842 = vmatpush3.msra.mxu1 %v1220_v12 }
 0x56e   :  { %1843 = vmatprep.subr.mxu1 %v2110_v0 }
 0x56f   :  { %1844 = vmatpush3.msra.mxu1 %v1219_v54 }
 0x570   :  { %1845 = vmatprep.subr.mxu1 %v2110_v0 }
 0x571   :  { %1846 = vmatpush3.msra.mxu1 %v1218_v55 }
 0x572   :  { %1847 = vmatprep.subr.mxu1 %v2110_v0 }
 0x573   :  { %1848 = vmatpush3.msra.mxu1 %v1217_v56 }
 0x574   :  { %1849 = vmatprep.subr.mxu1 %v2110_v0 }
 0x575   :  { %1850 = vmatpush3.msra.mxu1 %v1216_v57 }
 0x576   :  { %1851 = vmatprep.subr.mxu1 %v2110_v0 }
 0x577   :  { %1852 = vmatpush3.msra.mxu1 %v1215_v58 }
 0x578   :  { %1853 = vmatprep.subr.mxu1 %v2110_v0 }
 0x579   :  { %1854 = vmatpush3.msra.mxu1 %v1214_v59 }
 0x57a   :  { %1855 = vmatprep.subr.mxu1 %v2110_v0 }
 0x57b   :  { %1856 = vmatpush3.msra.mxu1 %v1213_v60 }
 0x57c   :  { %1857 = vmatprep.subr.mxu1 %v2110_v0 }
 0x57d   :  { %1858 = vmatpush3.msra.mxu1 %v1212_v61 }
 0x57e   :  { %1859 = vmatprep.subr.mxu1 %v2110_v0 }
 0x57f   :  { %1860 = vmatpush3.msra.mxu1 %v1211_v62 }
 0x580   :  { %1861 = vmatprep.subr.mxu1 %v2110_v0 }
 0x581   :  { %1862 = vmatpush3.msra.mxu1 %v1210_v63 }
 0x582   :  { %1863 = vmatprep.subr.mxu1 %v2110_v0 }
 0x583   :  { %1864 = vmatpush3.msra.mxu1 %v1209_v4 }
 0x584   :  { %1865 = vmatprep.subr.mxu1 %v2110_v0 }
 0x585   :  { %1866 = vmatpush3.msra.mxu1 %v1208_v5 }
 0x586   :  { %1867 = vmatprep.subr.mxu1 %v2110_v0 }
 0x587   :  { %1868 = vmatpush3.msra.mxu1 %v1207_v7 }
 0x588   :  { %1869 = vmatprep.subr.mxu1 %v2110_v0 }
 0x589   :  { %1870 = vmatpush3.msra.mxu1 %v1206_v8 }
 0x62a   :  { %v1045_v14 = vpop.f32.mrf.mxu1 }
 0x62b   :  { %v1050_v16 = vrot.slane %v1045_v14, 2  ;;  %v1051_v18 = vrot.slane %v1045_v14, 3  ;;  %v1052_v20 = vrot.slane %v1045_v14, 4  ;;  %v1053_v27 = vrot.slane %v1045_v14, 5 }
 0x62c   :  { %v1054_v28 = vrot.slane %v1045_v14, 6  ;;  %v1803_v29 = vpop.f32.mrf.mxu1  ;;  %v1055_v30 = vrot.slane %v1045_v14, 7  ;;  %v1056_v34 = vrot.slane %v1045_v14, 1  ;;  %v1071_v21 = vadd.f32 %v1045_v14, %v2359_v49 }
 0x62d   :  { %v1065_v31 = vadd.f32 %v1050_v16, %v2347_v37  ;;  %v1066_v32 = vadd.f32 %v1051_v18, %v2345_v36  ;;  %v1067_v33 = vadd.f32 %v1052_v20, %v2351_v40  ;;  %v1068_v35 = vadd.f32 %v1053_v27, %v2349_v38 }
 0x62e   :  { %v1069_v39 = vadd.f32 %v1054_v28, %v2355_v42  ;;  %v1070_v17 = vadd.f32 %v1055_v30, %v2353_v41  ;;  %v1072_v19 = vadd.f32 %v1056_v34, %v2357_v43 }
 0x62f   :  { %1978 = vtanh.f32 %v1065_v31 }
 0x630   :  { %1980 = vtanh.f32 %v1066_v32 }
 0x631   :  { %1982 = vtanh.f32 %v1067_v33 }
 0x632   :  { %1984 = vtanh.f32 %v1068_v35 }
 0x633   :  { %1986 = vtanh.f32 %v1069_v39 }
 0x634   :  { %1988 = vtanh.f32 %v1070_v17 }
 0x635   :  { %1990 = vtanh.f32 %v1072_v19 }
 0x636   :  { %1992 = vtanh.f32 %v1071_v21 }
 0x63c   :  { %v1979_v22 = vpop.eup %1978 }
 0x63d   :  { %v1981_v1 = vpop.eup %1980  ;;  %v1089_v2 = vrot.slane %v1979_v22, 6 }
 0x63e   :  { %v1983_v3 = vpop.eup %1982  ;;  %v1090_v23 = vrot.slane %v1981_v1, 5 }
 0x63f   :  { %v1985_v6 = vpop.eup %1984  ;;  %v1092_v24 = vrot.slane %v1983_v3, 4 }
 0x640   :  { %v1987_v9 = vpop.eup %1986  ;;  %v1091_v11 = vsel %vm333_vm2, %v1090_v23, %v1089_v2  ;;  %v1094_v25 = vrot.slane %v1985_v6, 3 }
 0x641   :  { %v1989_v26 = vpop.eup %1988  ;;  %v1093_v13 = vsel %vm336_vm3, %v1092_v24, %v1091_v11  ;;  %v1096_v15 = vrot.slane %v1987_v9, 2 }
 0x642   :  { %v1991_v44 = vpop.eup %1990  ;;  %v1095_v45 = vsel %vm339_vm4, %v1094_v25, %v1093_v13  ;;  %v1098_v46 = vrot.slane %v1989_v26, 1 }
 0x643   :  { %v1097_v47 = vsel %vm342_vm5, %v1096_v15, %v1095_v45  ;;  %v1993_v48 = vpop.eup %1992  ;;  %v1101_v51 = vrot.slane %v1991_v44, 7 }
 0x644   :  { %v1099_v50 = vsel %vm345_vm6, %v1098_v46, %v1097_v47 }
 0x645   :  { %v1100_v52 = vsel %vm348_vm7, %v1993_v48, %v1099_v50 }
 0x646   :  { %v1102_v53 = vsel %vm351_vm8, %v1101_v51, %v1100_v52 }
 0x647   :  { %1837 = vmatmul.mubr.f32.vlgmr.msra.gmra.mxu0 %v1102_v53 }
 0x707   :  { %v1170_v10 = vpop.f32.mrf.mxu0 }
 0x708   :  { %v1175_v12 = vrot.slane %v1170_v10, 1  ;;  %v1176_v14 = vrot.slane %v1170_v10, 2  ;;  %v1177_v16 = vrot.slane %v1170_v10, 3  ;;  %v1178_v18 = vrot.slane %v1170_v10, 4 }
 0x709   :  { %v1179_v20 = vrot.slane %v1170_v10, 5  ;;  %v1180_v27 = vrot.slane %v1170_v10, 6  ;;  %v1197_v28 = vadd.f32 %v1170_v10, %v2357_v43  ;;  %v1838_v29 = vpop.f32.mrf.mxu0  ;;  %v1181_v30 = vrot.slane %v1170_v10, 7 }
 0x70a   :  { %v1190_v31 = vadd.f32 %v1175_v12, %v2347_v37  ;;  %v1191_v32 = vadd.f32 %v1176_v14, %v2345_v36  ;;  %v1192_v33 = vadd.f32 %v1177_v16, %v2351_v40  ;;  %v1193_v0 = vadd.f32 %v1178_v18, %v2349_v38 }
 0x70b   :  { %1994 = vtanh.f32 %v1197_v28  ;;  %v1194_v34 = vadd.f32 %v1179_v20, %v2355_v42  ;;  %v1195_v35 = vadd.f32 %v1180_v27, %v2353_v41  ;;  %v1196_v39 = vadd.f32 %v1181_v30, %v2359_v49 }
 0x70c   :  { %1996 = vtanh.f32 %v1190_v31 }
 0x70d   :  { %1998 = vtanh.f32 %v1191_v32 }
 0x70e   :  { %2000 = vtanh.f32 %v1192_v33 }
 0x70f   :  { %2002 = vtanh.f32 %v1193_v0 }
 0x710   :  { %2004 = vtanh.f32 %v1194_v34 }
 0x711   :  { %2006 = vtanh.f32 %v1195_v35 }
 0x712   :  { %2008 = vtanh.f32 %v1196_v39 }
 0x718   :  { %v1995_v37 = vpop.eup %1994 }
 0x719   :  { %v1997_v36 = vpop.eup %1996  ;;  %v1334_v51 = vrot.slane %v1995_v37, 1 }
 0x71a   :  { %v1999_v43 = vpop.eup %1998  ;;  %1338 = vst [vmem:[#allocation8 - $0x7] sm:$0x80] %v1997_v36  ;;  %v1237_v40 = vrot.slane %v1997_v36, 7 }
 0x71b   :  { %v2001_v38 = vpop.eup %2000  ;;  %v1238_v17 = vrot.slane %v1999_v43, 6  ;;  %v1323_v19 = vrot.slane %v1999_v43, 7 }
 0x71c   :  { %v2003_v42 = vpop.eup %2002  ;;  %v1240_v21 = vrot.slane %v2001_v38, 5  ;;  %v1324_v22 = vrot.slane %v2001_v38, 6 }
 0x71d   :  { %v2005_v41 = vpop.eup %2004  ;;  %v1239_v1 = vsel %vm333_vm2, %v1238_v17, %v1237_v40  ;;  %v1242_v49 = vrot.slane %v2003_v42, 4  ;;  %v1326_v2 = vrot.slane %v2003_v42, 5 }
 0x71e   :  { %v2007_v3 = vpop.eup %2006  ;;  %v1241_v23 = vsel %vm336_vm3, %v1240_v21, %v1239_v1  ;;  %v1244_v6 = vrot.slane %v2005_v41, 3  ;;  %v1325_v24 = vsel %vm333_vm2, %v1324_v22, %v1323_v19  ;;  %v1328_v9 = vrot.slane %v2005_v41, 4 }
 0x71f   :  { %v2009_v11 = vpop.eup %2008  ;;  %v1243_v25 = vsel %vm339_vm4, %v1242_v49, %v1241_v23  ;;  %v1246_v26 = vrot.slane %v2007_v3, 2  ;;  %v1327_v13 = vsel %vm336_vm3, %v1326_v2, %v1325_v24  ;;  %v1330_v15 = vrot.slane %v2007_v3, 3 }
 0x720   :  { %v1245_v44 = vsel %vm342_vm5, %v1244_v6, %v1243_v25  ;;  %v1248_v45 = vrot.slane %v2009_v11, 1  ;;  %v1329_v46 = vsel %vm339_vm4, %v1328_v9, %v1327_v13  ;;  %v1332_v47 = vrot.slane %v2009_v11, 2 }
 0x721   :  { %v1247_v48 = vsel %vm345_vm6, %v1246_v26, %v1245_v44  ;;  %v1331_v50 = vsel %vm342_vm5, %v1330_v15, %v1329_v46 }
 0x722   :  { %v1249_v52 = vsel %vm348_vm7, %v1248_v45, %v1247_v48  ;;  %v1333_v53 = vsel %vm345_vm6, %v1332_v47, %v1331_v50 }
 0x723   :  { %v1250_v54 = vsel %vm351_vm8, %v1995_v37, %v1249_v52  ;;  %v1335_v55 = vsel %vm348_vm7, %v1334_v51, %v1333_v53 }
 0x724   :  { %1872 = vmatmul.mubr.f32.vlgmr.msra.gmra.mxu1 %v1250_v54  ;;  %1339 = vst [vmem:[#allocation8 + $0x1] sm:$0x7f] %v1335_v55 }
 0x725   :  { %2069 = shalt.err (!%p2066_p0)
}
 0x726   :  { %1359 = dma.vmem_to_hbm [thread:$0]  %s1357_s14, 128, %s2682_s8, [#allocation9]   ;;  %v1379_v56 = vld [vmem:[%s2680_s6] ss:$0 sm:$0xff] }
 0x727   :  { %s2113_s18 = smov [#allocation7]  }
 0x728   :  { %s1346_s19 = sshll.u32 %s2113_s18, 4  ;;  %s1347_s19 = int_to_ptr.vmem [resolvable:$true] %s1346_s19 }
 0x729   :  { %s2078_s20 = scalar_lea.vmem %s1347_s19, 128  ;;  %p2083_p2 = scmp.lt.s32.totalorder %s1347_s19, %s1347_s19 }
 0x72a   :  { %p2079_p1 = scmp.ne.s32.totalorder %s1347_s19, %s2078_s20  ;;  %p2084_p3 = scmp.lt.s32.totalorder %s2078_s20, %s2078_s20 }
 0x72c   :  { %p2085_p4 = por %p2084_p3, %p2083_p2 }
 0x72e   :  { %p2086_p5 = pnand %p2085_p4, %p2079_p1 }
 0x7e4   :  { %v1318_v57 = vpop.f32.mrf.mxu1 }
 0x7e5   :  { %v1319_v58 = vadd.f32 %v1379_v56, %v1318_v57 }
 0x7e6   :  { %v1873_v59 = vpop.f32.mrf.mxu1 }
 0x7e7   :  { %1322 = vst [vmem:[#allocation7] sm:$0xff] %v1319_v58 }
 0x7e8   :  { %2089 = shalt.err (!%p2086_p5)
}
 0x7e9   :  { %1349 = dma.vmem_to_hbm [thread:$0]  %s1347_s19, 128, %s2681_s7, [#allocation4]  }
 0x7ea   :  { %2102 = dma.done.wait [#allocation4], 128  }
 0x7eb   :  { %2103 = vsyncadd [#allocation4], 4294967168 }
 0x7ec   :  { %2104 = dma.done.wait [#allocation9], 128  }
 0x7ed   :  { %2105 = vsyncadd [#allocation9], 4294967168 }
 0x7ee   :  { %1366 = vsyncpa [#allocation3], 1 }
 0x7ef   :  { %1367 = vsyncpa [#allocation6], 1 }
 0x7f0   :  { %1368 = vsyncpa [#allocation4], 1 }
 0x7f1   :  { %1369 = vsyncpa [#allocation9], 1 }

</bundles_post_ra>
